<compile_context>
chip_gen: v5e
topology: v5e:2x2
jax: 0.10.0
libtpu: 0.0.40
codegen_flags: <defaults>
</compile_context>

<pallas_src>
import numpy as np

import jax
import jax.numpy as jnp
from jax import lax
from jax.experimental import pallas as pl
from jax.experimental.pallas import tpu as pltpu

_LANES = 128
_CH_PAD = 16            # interior channel padding (bf16 sublane multiple)


def _round_up(x, m):
    return ((x + m - 1) // m) * m


def _cdiv(a, b):
    return (a + b - 1) // b


# ----------------------------------------------------------------------------
# Static geometry: channels from layer_params, spatial from the input shape
# ----------------------------------------------------------------------------
def _channel_geometry(layer_params):
    geo = []
    for l, lp in enumerate(layer_params):
        k = lp["kernel_size"]
        g = dict(k=k, s=lp["stride"], p=lp["padding"],
                 cin=lp["in_channels"], cout=lp["out_channels"],
                 cp=_round_up(lp["out_channels"], _CH_PAD))
        if l == 0:
            g["kdim"] = _round_up(k * k * g["cin"], _LANES)  # lane-dense patches
        else:
            g["kdim"] = k * k * geo[l - 1]["cp"]
        geo.append(g)
    return geo


def _spatial_geometry(geo, h, w):
    L = len(geo)
    sp = []
    for g in geo:
        oh = (h + 2 * g["p"] - g["k"]) // g["s"] + 1
        ow = (w + 2 * g["p"] - g["k"]) // g["s"] + 1
        sp.append(dict(ih=h, iw=w, oh=oh, ow=ow))
        h, w = oh, ow
    for l in range(L):
        sigma = geo[l + 1]["s"] if l < L - 1 else 1   # phase split wrt next stride
        ph, pw = _cdiv(sp[l]["oh"], sigma), _cdiv(sp[l]["ow"], sigma)
        sp[l].update(sigma=sigma, ph=ph, pw=pw, m=sigma * sigma * ph * pw)
    return sp


# ----------------------------------------------------------------------------
# Wrapper-side, one-off, lane-dense im2col for the first (tiny-Cin) layer.
# Rows are ordered phase-major w.r.t. the NEXT layer's stride so the fused
# kernel can slice stride-s taps of the layer-0 activation statically.
# ----------------------------------------------------------------------------
def _build_layer0_patches(x_nhwc, cfg, dtype):
    n = x_nhwc.shape[0]
    cin = cfg["cin"]
    k, s, p = cfg["k"], cfg["s"], cfg["p"]
    oh, ow, sigma = cfg["oh"], cfg["ow"], cfg["sigma"]
    ph, pw = cfg["ph"], cfg["pw"]

    xp = jnp.pad(x_nhwc, ((0, 0), (p, p), (p, p), (0, 0)))

    # Static (trace-time) index construction with numpy.
    r_idx, q_idx, valid = [], [], []
    for ri in range(sigma):
        for rj in range(sigma):
            for a in range(ph):
                for b in range(pw):
                    r, q = sigma * a + ri, sigma * b + rj
                    valid.append(1.0 if (r < oh and q < ow) else 0.0)
                    r_idx.append(min(r, oh - 1))
                    q_idx.append(min(q, ow - 1))
    r_idx = np.asarray(r_idx, np.int32)
    q_idx = np.asarray(q_idx, np.int32)
    valid = np.asarray(valid, np.float32)

    di = np.repeat(np.arange(k, dtype=np.int32), k)
    dj = np.tile(np.arange(k, dtype=np.int32), k)
    rows = s * r_idx[:, None] + di[None, :]            # (M0, k*k)
    cols = s * q_idx[:, None] + dj[None, :]

    pat = xp[:, rows, cols, :]                         # (N, M0, k*k, Cin) gather
    m0 = r_idx.shape[0]
    pat = pat.reshape(n, m0, k * k * cin) * valid[None, :, None]
    k0 = k * k * cin
    if cfg["kdim"] > k0:
        pat = jnp.pad(pat, ((0, 0), (0, 0), (0, cfg["kdim"] - k0)))
    return pat.astype(dtype)


# ----------------------------------------------------------------------------
# Fused multi-layer conv+bias+ReLU kernel (one image per grid step)
# ----------------------------------------------------------------------------
def _make_fused_kernel(cfgs, compute_dtype):
    L = len(cfgs)

    def kernel(*refs):
        pats_ref = refs[0]
        w_refs = refs[1:1 + L]
        b_refs = refs[1 + L:1 + 2 * L]
        o_ref = refs[1 + 2 * L]
        scratch = refs[2 + 2 * L:]
        act_refs = scratch[:L - 1]
        col_refs = scratch[L - 1:]

        h = None
        for l, c in enumerate(cfgs):
            if l == 0:
                x_l = pats_ref[0]                        # (M0, kdim0) bf16
            else:
                prev = cfgs[l - 1]
                sig, cpi = c["s"], prev["cp"]
                k, p = c["k"], c["p"]
                ih, iw = c["ih"], c["iw"]
                oh, ow = c["oh"], c["ow"]
                # Stage the previous activation (f32) phase-split into VMEM.
                act = act_refs[l - 1]
                act[...] = h.reshape(sig * sig, prev["ph"], prev["pw"], cpi)
                # Build this layer's im2col with static contiguous slice
                # copies; the zero fill realizes the conv's spatial padding.
                col = col_refs[l - 1]
                col[...] = jnp.zeros_like(col)
                for di in range(k):
                    ri, da = (di - p) % sig, (di - p) // sig
                    ha = _cdiv(ih - ri, sig)
                    i0, i1 = max(0, -da), min(oh, ha - da)
                    if i1 <= i0:
                        continue
                    for dj in range(k):
                        rj, db = (dj - p) % sig, (dj - p) // sig
                        wa = _cdiv(iw - rj, sig)
                        j0, j1 = max(0, -db), min(ow, wa - db)
                        if j1 <= j0:
                            continue
                        t = di * k + dj
                        col[i0:i1, j0:j1, t * cpi:(t + 1) * cpi] = act[
                            ri * sig + rj,
                            i0 + da:i1 + da,
                            j0 + db:j1 + db, :]
                # ONE reshape + ONE cast + ONE concatenated-K MXU matmul.
                x_l = col[...].reshape(oh * ow, c["kdim"]).astype(compute_dtype)
            acc = jnp.dot(x_l, w_refs[l][...],
                          preferred_element_type=jnp.float32)
            h = jnp.maximum(acc + b_refs[l][...], 0.0)   # bias + ReLU in f32
        o_ref[0] = h.astype(o_ref.dtype)

    return kernel


# ----------------------------------------------------------------------------
# Parameter init / prep (weight folding hoisted out of the jitted forward)
# ----------------------------------------------------------------------------
def init_encoder_params(params, key):
    """Deterministically initialize Conv2d weights/biases (PyTorch layout)."""
    assert params["model_type"] == "conv", "Invalid model type found."
    weights = []
    for lp in params["layer_params"]:
        cin, cout, k = lp["in_channels"], lp["out_channels"], lp["kernel_size"]
        key, wk, bk = jax.random.split(key, 3)
        w = jax.random.normal(wk, (cout, cin, k, k), jnp.float32) * 0.1
        b = jax.random.normal(bk, (cout,), jnp.float32) * 0.1
        weights.append((w, b))
    return weights


def prepare_encoder_params(layer_params, weights, compute_dtype=jnp.bfloat16):
    """Fold weights once at parameter-prep time.

    Layer 0:  (Cout,Cin,k,k) -> (kdim0, cp0) with (di,dj,c)-major rows,
              zero-padded up to the lane-dense patch width kdim0.
    Layer l:  (Cout,Cin,k,k) -> (k*k*cp_{l-1}, cp_l) with zero rows/cols for
              padded channels (padding never contributes).
    """
    geo = _channel_geometry(layer_params)
    prepared = []
    for l, (g, (w, b)) in enumerate(zip(geo, weights)):
        k, cin, cout, cp = g["k"], g["cin"], g["cout"], g["cp"]
        cin_p = cin if l == 0 else geo[l - 1]["cp"]
        wt = jnp.transpose(w, (2, 3, 1, 0))              # (k, k, Cin, Cout)
        wt = jnp.pad(wt, ((0, 0), (0, 0),
                          (0, cin_p - cin), (0, cp - cout)))
        wf = wt.reshape(k * k * cin_p, cp)
        if g["kdim"] > k * k * cin_p:
            wf = jnp.pad(wf, ((0, g["kdim"] - k * k * cin_p), (0, 0)))
        bf = jnp.pad(b, (0, cp - cout)).astype(jnp.float32).reshape(1, cp)
        prepared.append((wf.astype(compute_dtype), bf))
    return prepared


# ----------------------------------------------------------------------------
# Encoder forward: the whole conv stack is ONE pallas_call
# ----------------------------------------------------------------------------
def make_encoder_forward(layer_params, compute_dtype=jnp.bfloat16):
    layer_params = tuple(dict(lp) for lp in layer_params)
    geo = _channel_geometry(layer_params)
    L = len(geo)
    for l in range(2, L):
        if geo[l]["s"] != 1:
            # TODO(synk): stride>1 beyond the second layer needs strided phase
            # reads of an in-kernel activation; not implemented.
            raise NotImplementedError(
                "stride > 1 only supported for the first two layers")

    @jax.jit
    def forward(x_nchw, prepared):
        n, _, h, w = x_nchw.shape
        sp = _spatial_geometry(geo, h, w)
        cfgs = tuple({**geo[l], **sp[l]} for l in range(L))

        x = jnp.transpose(x_nchw, (0, 2, 3, 1))            # NCHW -> NHWC
        pats = _build_layer0_patches(x, cfgs[0], compute_dtype)

        m_last = cfgs[-1]["oh"] * cfgs[-1]["ow"]
        cp_last = cfgs[-1]["cp"]

        in_specs = [pl.BlockSpec((1, cfgs[0]["m"], cfgs[0]["kdim"]),
                                 lambda i: (i, 0, 0))]
        in_specs += [pl.BlockSpec((c["kdim"], c["cp"]), lambda i: (0, 0))
                     for c in cfgs]
        in_specs += [pl.BlockSpec((1, c["cp"]), lambda i: (0, 0))
                     for c in cfgs]

        scratch_shapes = [
            pltpu.VMEM((cfgs[l]["sigma"] ** 2, cfgs[l]["ph"], cfgs[l]["pw"],
                        cfgs[l]["cp"]), jnp.float32)
            for l in range(L - 1)
        ] + [
            pltpu.VMEM((cfgs[l]["oh"], cfgs[l]["ow"], cfgs[l]["kdim"]),
                       jnp.float32)
            for l in range(1, L)
        ]

        flops = sum(2 * n * c["oh"] * c["ow"] * c["k"] * c["k"]
                    * c["cin"] * c["cout"] for c in cfgs)
        bytes_accessed = (
            pats.size * pats.dtype.itemsize
            + sum(wf.size * wf.dtype.itemsize + bf.size * bf.dtype.itemsize
                  for wf, bf in prepared)
            + n * m_last * cp_last * 4)

        out = pl.pallas_call(
            _make_fused_kernel(cfgs, compute_dtype),
            out_shape=jax.ShapeDtypeStruct((n, m_last, cp_last), jnp.float32),
            grid_spec=pltpu.PrefetchScalarGridSpec(
                num_scalar_prefetch=0,
                grid=(n,),                                  # one image / step
                in_specs=in_specs,
                out_specs=pl.BlockSpec((1, m_last, cp_last),
                                       lambda i: (i, 0, 0)),
                scratch_shapes=scratch_shapes),
            compiler_params=pltpu.CompilerParams(
                dimension_semantics=("parallel",),
                vmem_limit_bytes=32 * 1024 * 1024),
            cost_estimate=pl.CostEstimate(flops=flops, transcendentals=0,
                                          bytes_accessed=bytes_accessed),
        )(pats, *(wf for wf, _ in prepared), *(bf for _, bf in prepared))

        out = out[..., :cfgs[-1]["cout"]]
        out = out.reshape(n, cfgs[-1]["oh"], cfgs[-1]["ow"], cfgs[-1]["cout"])
        return jnp.transpose(out, (0, 3, 1, 2))             # NHWC -> NCHW

    return forward


# ----------------------------------------------------------------------------
# Pure-JAX reference (lax conv) for correctness check
# ----------------------------------------------------------------------------
def encoder_reference(x_nchw, weights, layer_params):
    x = x_nchw
    for (w, b), cfg in zip(weights, layer_params):
        s, p = cfg["stride"], cfg["padding"]
        y = lax.conv_general_dilated(
            x, w, window_strides=(s, s), padding=((p, p), (p, p)),
            dimension_numbers=("NCHW", "OIHW", "NCHW"))
        x = jnp.maximum(y + b.reshape(1, -1, 1, 1), 0.0)
    return x


if __name__ == "__main__":
    params = {
        "model_type": "conv",
        "layer_params": [
            {"in_channels": 4, "out_channels": 8, "kernel_size": 3,
             "stride": 1, "padding": 1},
            {"in_channels": 8, "out_channels": 16, "kernel_size": 3,
             "stride": 2, "padding": 1},
        ],
    }

    key = jax.random.PRNGKey(0)
    key, xk = jax.random.split(key)
    x = jax.random.normal(xk, (2, 4, 16, 16), jnp.float32)    # NCHW like PyTorch

    weights = init_encoder_params(params, key)
    prepared = prepare_encoder_params(params["layer_params"], weights)
    forward = make_encoder_forward(params["layer_params"])

    out = jax.block_until_ready(forward(x, prepared))
    ref = jax.block_until_ready(
        encoder_reference(x, weights, params["layer_params"]))

    assert out.shape == ref.shape, (out.shape, ref.shape)
    # bf16 MXU inputs with f32 accumulation (activations kept f32 in VMEM).
    assert jnp.allclose(out, ref, atol=3e-2, rtol=3e-2), "mismatch vs reference"

    print("KERNEL_OK")
</pallas_src>

<mosaic_0001>
module attributes {stable_mosaic.version = 11 : i64} {
  func.func @kernel(%arg0: i32, %arg1: memref<1x256x128xbf16, #tpu.memory_space<vmem>>, %arg2: memref<128x16xbf16, #tpu.memory_space<vmem>>, %arg3: memref<144x16xbf16, #tpu.memory_space<vmem>>, %arg4: memref<1x16xf32, #tpu.memory_space<vmem>>, %arg5: memref<1x16xf32, #tpu.memory_space<vmem>>, %arg6: memref<1x64x16xf32, #tpu.memory_space<vmem>>, %arg7: memref<4x8x8x16xf32, #tpu.memory_space<vmem>>, %arg8: memref<8x8x144xf32, #tpu.memory_space<vmem>>) attributes {dimension_semantics = [#tpu.dimension_semantics<parallel>], iteration_bounds = array<i64: 2>, scalar_prefetch = 0 : i64, scratch_operands = 2 : i64, tpu.core_type = #tpu.core_type<tc>, window_params = [{transform_indices = @transform_0, window_bounds = array<i64: 1, 256, 128>}, {pipeline_mode = #tpu.pipeline_mode<synchronous>, transform_indices = @transform_1, window_bounds = array<i64: 128, 16>}, {pipeline_mode = #tpu.pipeline_mode<synchronous>, transform_indices = @transform_2, window_bounds = array<i64: 144, 16>}, {pipeline_mode = #tpu.pipeline_mode<synchronous>, transform_indices = @transform_3, window_bounds = array<i64: 1, 16>}, {pipeline_mode = #tpu.pipeline_mode<synchronous>, transform_indices = @transform_4, window_bounds = array<i64: 1, 16>}, {transform_indices = @transform_5, window_bounds = array<i64: 1, 64, 16>}]} {
    %c0 = arith.constant 0 : index
    %c0_0 = arith.constant 0 : index
    %c0_1 = arith.constant 0 : index
    %0 = vector.load %arg1[%c0, %c0_0, %c0_1] : memref<1x256x128xbf16, #tpu.memory_space<vmem>>, vector<1x256x128xbf16>
    %1 = vector.shape_cast %0 : vector<1x256x128xbf16> to vector<256x128xbf16>
    %c0_2 = arith.constant 0 : index
    %c0_3 = arith.constant 0 : index
    %2 = vector.load %arg2[%c0_2, %c0_3] : memref<128x16xbf16, #tpu.memory_space<vmem>>, vector<128x16xbf16>
    %cst = arith.constant dense<0.000000e+00> : vector<256x16xf32>
    %3 = tpu.matmul %1, %2, %cst {dimension_numbers = #tpu.dot_dimension_numbers<[1], [0], [0], [1], [0, 0, 1, 1], [], []>} : vector<256x128xbf16>, vector<128x16xbf16>, vector<256x16xf32> -> vector<256x16xf32>
    %c0_4 = arith.constant 0 : index
    %c0_5 = arith.constant 0 : index
    %4 = vector.load %arg4[%c0_4, %c0_5] : memref<1x16xf32, #tpu.memory_space<vmem>>, vector<1x16xf32>
    %5 = vector.broadcast %4 : vector<1x16xf32> to vector<256x16xf32>
    %6 = arith.addf %3, %5 : vector<256x16xf32>
    %cst_6 = arith.constant 0.000000e+00 : f32
    %7 = vector.broadcast %cst_6 : f32 to vector<256x16xf32>
    %8 = arith.maximumf %6, %7 : vector<256x16xf32>
    %9 = vector.shape_cast %8 : vector<256x16xf32> to vector<4x8x8x16xf32>
    %c0_7 = arith.constant 0 : index
    %c0_8 = arith.constant 0 : index
    %c0_9 = arith.constant 0 : index
    %c0_10 = arith.constant 0 : index
    %10 = vector.load %arg7[%c0_7, %c0_8, %c0_9, %c0_10] : memref<4x8x8x16xf32, #tpu.memory_space<vmem>>, vector<4x8x8x16xf32>
    tpu.vector_store %arg7[%c0_7, %c0_8, %c0_9, %c0_10], %9 {strides = array<i32>} : memref<4x8x8x16xf32, #tpu.memory_space<vmem>>, vector<4x8x8x16xf32>,
    %cst_11 = arith.constant 0.000000e+00 : f32
    %11 = vector.broadcast %cst_11 : f32 to vector<8x8x144xf32>
    %c0_12 = arith.constant 0 : index
    %c0_13 = arith.constant 0 : index
    %c0_14 = arith.constant 0 : index
    %12 = vector.load %arg8[%c0_12, %c0_13, %c0_14] : memref<8x8x144xf32, #tpu.memory_space<vmem>>, vector<8x8x144xf32>
    tpu.vector_store %arg8[%c0_12, %c0_13, %c0_14], %11 {strides = array<i32>} : memref<8x8x144xf32, #tpu.memory_space<vmem>>, vector<8x8x144xf32>,
    %c3 = arith.constant 3 : index
    %c0_15 = arith.constant 0 : index
    %c0_16 = arith.constant 0 : index
    %c0_17 = arith.constant 0 : index
    %13 = vector.load %arg7[%c3, %c0_15, %c0_16, %c0_17] : memref<4x8x8x16xf32, #tpu.memory_space<vmem>>, vector<1x7x7x16xf32>
    %14 = vector.shape_cast %13 : vector<1x7x7x16xf32> to vector<7x7x16xf32>
    %c1 = arith.constant 1 : index
    %c1_18 = arith.constant 1 : index
    %c0_19 = arith.constant 0 : index
    %15 = vector.load %arg8[%c1, %c1_18, %c0_19] : memref<8x8x144xf32, #tpu.memory_space<vmem>>, vector<7x7x16xf32>
    tpu.vector_store %arg8[%c1, %c1_18, %c0_19], %14 {strides = array<i32>} : memref<8x8x144xf32, #tpu.memory_space<vmem>>, vector<7x7x16xf32>,
    %c2 = arith.constant 2 : index
    %c0_20 = arith.constant 0 : index
    %c0_21 = arith.constant 0 : index
    %c0_22 = arith.constant 0 : index
    %16 = vector.load %arg7[%c2, %c0_20, %c0_21, %c0_22] : memref<4x8x8x16xf32, #tpu.memory_space<vmem>>, vector<1x7x8x16xf32>
    %17 = vector.shape_cast %16 : vector<1x7x8x16xf32> to vector<7x8x16xf32>
    %c1_23 = arith.constant 1 : index
    %c0_24 = arith.constant 0 : index
    %c16 = arith.constant 16 : index
    %18 = vector.load %arg8[%c1_23, %c0_24, %c16] : memref<8x8x144xf32, #tpu.memory_space<vmem>>, vector<7x8x16xf32>
    tpu.vector_store %arg8[%c1_23, %c0_24, %c16], %17 {strides = array<i32>} : memref<8x8x144xf32, #tpu.memory_space<vmem>>, vector<7x8x16xf32>,
    %c3_25 = arith.constant 3 : index
    %c0_26 = arith.constant 0 : index
    %c0_27 = arith.constant 0 : index
    %c0_28 = arith.constant 0 : index
    %19 = vector.load %arg7[%c3_25, %c0_26, %c0_27, %c0_28] : memref<4x8x8x16xf32, #tpu.memory_space<vmem>>, vector<1x7x8x16xf32>
    %20 = vector.shape_cast %19 : vector<1x7x8x16xf32> to vector<7x8x16xf32>
    %c1_29 = arith.constant 1 : index
    %c0_30 = arith.constant 0 : index
    %c32 = arith.constant 32 : index
    %21 = vector.load %arg8[%c1_29, %c0_30, %c32] : memref<8x8x144xf32, #tpu.memory_space<vmem>>, vector<7x8x16xf32>
    tpu.vector_store %arg8[%c1_29, %c0_30, %c32], %20 {strides = array<i32>} : memref<8x8x144xf32, #tpu.memory_space<vmem>>, vector<7x8x16xf32>,
    %c1_31 = arith.constant 1 : index
    %c0_32 = arith.constant 0 : index
    %c0_33 = arith.constant 0 : index
    %c0_34 = arith.constant 0 : index
    %22 = vector.load %arg7[%c1_31, %c0_32, %c0_33, %c0_34] : memref<4x8x8x16xf32, #tpu.memory_space<vmem>>, vector<1x8x7x16xf32>
    %23 = vector.shape_cast %22 : vector<1x8x7x16xf32> to vector<8x7x16xf32>
    %c0_35 = arith.constant 0 : index
    %c1_36 = arith.constant 1 : index
    %c48 = arith.constant 48 : index
    %24 = vector.load %arg8[%c0_35, %c1_36, %c48] : memref<8x8x144xf32, #tpu.memory_space<vmem>>, vector<8x7x16xf32>
    tpu.vector_store %arg8[%c0_35, %c1_36, %c48], %23 {strides = array<i32>} : memref<8x8x144xf32, #tpu.memory_space<vmem>>, vector<8x7x16xf32>,
    %c0_37 = arith.constant 0 : index
    %c0_38 = arith.constant 0 : index
    %c0_39 = arith.constant 0 : index
    %c0_40 = arith.constant 0 : index
    %25 = vector.load %arg7[%c0_37, %c0_38, %c0_39, %c0_40] : memref<4x8x8x16xf32, #tpu.memory_space<vmem>>, vector<1x8x8x16xf32>
    %26 = vector.shape_cast %25 : vector<1x8x8x16xf32> to vector<8x8x16xf32>
    %c0_41 = arith.constant 0 : index
    %c0_42 = arith.constant 0 : index
    %c64 = arith.constant 64 : index
    %27 = vector.load %arg8[%c0_41, %c0_42, %c64] : memref<8x8x144xf32, #tpu.memory_space<vmem>>, vector<8x8x16xf32>
    tpu.vector_store %arg8[%c0_41, %c0_42, %c64], %26 {strides = array<i32>} : memref<8x8x144xf32, #tpu.memory_space<vmem>>, vector<8x8x16xf32>,
    %c1_43 = arith.constant 1 : index
    %c0_44 = arith.constant 0 : index
    %c0_45 = arith.constant 0 : index
    %c0_46 = arith.constant 0 : index
    %28 = vector.load %arg7[%c1_43, %c0_44, %c0_45, %c0_46] : memref<4x8x8x16xf32, #tpu.memory_space<vmem>>, vector<1x8x8x16xf32>
    %29 = vector.shape_cast %28 : vector<1x8x8x16xf32> to vector<8x8x16xf32>
    %c0_47 = arith.constant 0 : index
    %c0_48 = arith.constant 0 : index
    %c80 = arith.constant 80 : index
    %30 = vector.load %arg8[%c0_47, %c0_48, %c80] : memref<8x8x144xf32, #tpu.memory_space<vmem>>, vector<8x8x16xf32>
    tpu.vector_store %arg8[%c0_47, %c0_48, %c80], %29 {strides = array<i32>} : memref<8x8x144xf32, #tpu.memory_space<vmem>>, vector<8x8x16xf32>,
    %c3_49 = arith.constant 3 : index
    %c0_50 = arith.constant 0 : index
    %c0_51 = arith.constant 0 : index
    %c0_52 = arith.constant 0 : index
    %31 = vector.load %arg7[%c3_49, %c0_50, %c0_51, %c0_52] : memref<4x8x8x16xf32, #tpu.memory_space<vmem>>, vector<1x8x7x16xf32>
    %32 = vector.shape_cast %31 : vector<1x8x7x16xf32> to vector<8x7x16xf32>
    %c0_53 = arith.constant 0 : index
    %c1_54 = arith.constant 1 : index
    %c96 = arith.constant 96 : index
    %33 = vector.load %arg8[%c0_53, %c1_54, %c96] : memref<8x8x144xf32, #tpu.memory_space<vmem>>, vector<8x7x16xf32>
    tpu.vector_store %arg8[%c0_53, %c1_54, %c96], %32 {strides = array<i32>} : memref<8x8x144xf32, #tpu.memory_space<vmem>>, vector<8x7x16xf32>,
    %c2_55 = arith.constant 2 : index
    %c0_56 = arith.constant 0 : index
    %c0_57 = arith.constant 0 : index
    %c0_58 = arith.constant 0 : index
    %34 = vector.load %arg7[%c2_55, %c0_56, %c0_57, %c0_58] : memref<4x8x8x16xf32, #tpu.memory_space<vmem>>, vector<1x8x8x16xf32>
    %35 = vector.shape_cast %34 : vector<1x8x8x16xf32> to vector<8x8x16xf32>
    %c0_59 = arith.constant 0 : index
    %c0_60 = arith.constant 0 : index
    %c112 = arith.constant 112 : index
    %36 = vector.load %arg8[%c0_59, %c0_60, %c112] : memref<8x8x144xf32, #tpu.memory_space<vmem>>, vector<8x8x16xf32>
    tpu.vector_store %arg8[%c0_59, %c0_60, %c112], %35 {strides = array<i32>} : memref<8x8x144xf32, #tpu.memory_space<vmem>>, vector<8x8x16xf32>,
    %c3_61 = arith.constant 3 : index
    %c0_62 = arith.constant 0 : index
    %c0_63 = arith.constant 0 : index
    %c0_64 = arith.constant 0 : index
    %37 = vector.load %arg7[%c3_61, %c0_62, %c0_63, %c0_64] : memref<4x8x8x16xf32, #tpu.memory_space<vmem>>, vector<1x8x8x16xf32>
    %38 = vector.shape_cast %37 : vector<1x8x8x16xf32> to vector<8x8x16xf32>
    %c0_65 = arith.constant 0 : index
    %c0_66 = arith.constant 0 : index
    %c128 = arith.constant 128 : index
    %39 = vector.load %arg8[%c0_65, %c0_66, %c128] : memref<8x8x144xf32, #tpu.memory_space<vmem>>, vector<8x8x16xf32>
    tpu.vector_store %arg8[%c0_65, %c0_66, %c128], %38 {strides = array<i32>} : memref<8x8x144xf32, #tpu.memory_space<vmem>>, vector<8x8x16xf32>,
    %c0_67 = arith.constant 0 : index
    %c0_68 = arith.constant 0 : index
    %c0_69 = arith.constant 0 : index
    %40 = vector.load %arg8[%c0_67, %c0_68, %c0_69] : memref<8x8x144xf32, #tpu.memory_space<vmem>>, vector<8x8x144xf32>
    %41 = vector.shape_cast %40 : vector<8x8x144xf32> to vector<64x144xf32>
    %42 = arith.truncf %41 : vector<64x144xf32> to vector<64x144xbf16>
    %c0_70 = arith.constant 0 : index
    %c0_71 = arith.constant 0 : index
    %43 = vector.load %arg3[%c0_70, %c0_71] : memref<144x16xbf16, #tpu.memory_space<vmem>>, vector<144x16xbf16>
    %cst_72 = arith.constant dense<0.000000e+00> : vector<64x16xf32>
    %44 = tpu.matmul %42, %43, %cst_72 {dimension_numbers = #tpu.dot_dimension_numbers<[1], [0], [0], [1], [0, 0, 1, 1], [], []>} : vector<64x144xbf16>, vector<144x16xbf16>, vector<64x16xf32> -> vector<64x16xf32>
    %c0_73 = arith.constant 0 : index
    %c0_74 = arith.constant 0 : index
    %45 = vector.load %arg5[%c0_73, %c0_74] : memref<1x16xf32, #tpu.memory_space<vmem>>, vector<1x16xf32>
    %46 = vector.broadcast %45 : vector<1x16xf32> to vector<64x16xf32>
    %47 = arith.addf %44, %46 : vector<64x16xf32>
    %cst_75 = arith.constant 0.000000e+00 : f32
    %48 = vector.broadcast %cst_75 : f32 to vector<64x16xf32>
    %49 = arith.maximumf %47, %48 : vector<64x16xf32>
    %c0_76 = arith.constant 0 : index
    %c0_77 = arith.constant 0 : index
    %c0_78 = arith.constant 0 : index
    %50 = vector.load %arg6[%c0_76, %c0_77, %c0_78] : memref<1x64x16xf32, #tpu.memory_space<vmem>>, vector<1x64x16xf32>
    %51 = vector.shape_cast %50 : vector<1x64x16xf32> to vector<64x16xf32>
    %52 = vector.shape_cast %49 : vector<64x16xf32> to vector<1x64x16xf32>
    tpu.vector_store %arg6[%c0_76, %c0_77, %c0_78], %52 {strides = array<i32>} : memref<1x64x16xf32, #tpu.memory_space<vmem>>, vector<1x64x16xf32>,
    return
  }
  func.func @transform_0(%arg0: i32) -> (i32, i32, i32) {
    %c0_i32 = arith.constant 0 : i32
    %c0_i32_0 = arith.constant 0 : i32
    %c0_i32_1 = arith.constant 0 : i32
    return %arg0, %c0_i32, %c0_i32_0 : i32, i32, i32
  }
  func.func @transform_1(%arg0: i32) -> (i32, i32) {
    %c0_i32 = arith.constant 0 : i32
    %c0_i32_0 = arith.constant 0 : i32
    %c0_i32_1 = arith.constant 0 : i32
    return %c0_i32, %c0_i32_0 : i32, i32
  }
  func.func @transform_2(%arg0: i32) -> (i32, i32) {
    %c0_i32 = arith.constant 0 : i32
    %c0_i32_0 = arith.constant 0 : i32
    %c0_i32_1 = arith.constant 0 : i32
    return %c0_i32, %c0_i32_0 : i32, i32
  }
  func.func @transform_3(%arg0: i32) -> (i32, i32) {
    %c0_i32 = arith.constant 0 : i32
    %c0_i32_0 = arith.constant 0 : i32
    %c0_i32_1 = arith.constant 0 : i32
    return %c0_i32, %c0_i32_0 : i32, i32
  }
  func.func @transform_4(%arg0: i32) -> (i32, i32) {
    %c0_i32 = arith.constant 0 : i32
    %c0_i32_0 = arith.constant 0 : i32
    %c0_i32_1 = arith.constant 0 : i32
    return %c0_i32, %c0_i32_0 : i32, i32
  }
  func.func @transform_5(%arg0: i32) -> (i32, i32, i32) {
    %c0_i32 = arith.constant 0 : i32
    %c0_i32_0 = arith.constant 0 : i32
    %c0_i32_1 = arith.constant 0 : i32
    return %arg0, %c0_i32, %c0_i32_0 : i32, i32, i32
  }
}

</mosaic_0001>

<bundles_post_ra>
// kernel: forward.1
= control target key start
LH: loop header
LB: loop body
LE: loop exit
PB: predicated region body
PF: predicated region fallthrough
CT: control target
= control target key end

     0   :  { %10 = vsyncpa [#allocation5], 0  ;;  %s2059_s0 = inlined_call_operand.vmem [shape: bf16[2,256,128], index: 0, kind: input, shape index: {}]   ;;  %s2060_s1 = inlined_call_operand.vmem [shape: bf16[128,16], index: 1, kind: input, shape index: {}]   ;;  %s2061_s2 = inlined_call_operand.vmem [shape: bf16[144,16], index: 2, kind: input, shape index: {}]   ;;  %s2062_s3 = inlined_call_operand.vmem [shape: f32[1,16], index: 3, kind: input, shape index: {}]   ;;  %s2063_s4 = inlined_call_operand.vmem [shape: f32[1,16], index: 4, kind: input, shape index: {}]   ;;  %s2064_s5 = inlined_call_operand.hbm [shape: f32[2,64,16], index: 5, kind: output, shape index: {}]  }
   0x1   :  { %12 = vsyncpa [#allocation5 + $0x1], 0  ;;  %s1619_s18 = smov 0   ;;  %s1621_s19 = smov 0  }
   0x2   :  { %s1623_s20 = smov 0   ;;  %s1625_s21 = smov 0  }
   0x3 LB: > { %s1640_s22 = sadd.s32 4294967295, %s1577_s21   ;;  %s1257_s23 = sadd.s32 4294967294, %s1577_s21   ;;  %s1577_s21 = sphi %s1625_s21, %s2070_s21   ;;  %s1573_s20 = sphi %s1623_s20, %s2069_s20   ;;  %s1569_s19 = sphi %s1621_s19, %s2068_s19   ;;  %s1565_s18 = sphi %s1619_s18, %s2067_s18  }
   0x4   : > { %s1644_s24 = sadd.s32 1, %s1577_s21   ;;  %s135_s25 = sadd.s32 1, %s1573_s20 }
   0x5   : > { %s132_s26 = ssub.s32 %s1577_s21, %s1644_s24  ;;  %p145_p0 = scmp.ne.s32.totalorder %s1573_s20, %s1569_s19 }
   0x6   : > { %p133_p1 = scmp.eq.s32.totalorder %s132_s26, 0  ;;  %p146_p2 = scmp.eq.s32.totalorder %s1640_s22, 1 }
   0x7   : > { %p151_p3 = scmp.ne.s32.totalorder %s1569_s19, %s1565_s18  ;;  %p152_p4 = scmp.eq.s32.totalorder %s1257_s23, 1 }
   0x8   : > { %s1655_s27 = scalar_select %p133_p1, %s1573_s20, %s135_s25  }
   0x9   : > { %p1657_p5 = por %p146_p2, %p145_p0  ;;  %p1661_p6 = por %p152_p4, %p151_p3 }
   0xa   : > { %p1260_p7 = scmp.ge.s32.totalorder %s1577_s21, 1  ;;  %p190_p8 = scmp.lt.s32.totalorder %s1577_s21, 3 }
   0xc   : > { %p191_p9 = pnand %p1260_p7, %p190_p8 }
   0xd   : > { %p218_p10 = scmp.lt.s32.totalorder (!%p191_p9), %s1640_s22, 1  ;;  %s1579_s12 = smov (!%p191_p9), 64  }
   0xe   : > { %194 = sbr.rel (%p191_p9) target bundleno = 604 (0x25c), region = 40  ;;  %s1580_s13 = smov (!%p191_p9), 80  }
   0xf   : > { %s1581_s14 = smov (!%p191_p9), 48   ;;  %s1583_s15 = smov (!%p191_p9), 112  }
  0x10   : > { %s1584_s16 = smov (!%p191_p9), 16   ;;  %s1585_s25 = smov (!%p191_p9), 32  }
  0x11   : > { %s215_s7 = sand.u32 (!%p191_p9), 1, %s1569_s19   ;;  %s1439_s10 = sshll.u32 (!%p191_p9), %s1640_s22, 6 }
  0x12   : > { %s1261_s8 = sshll.u32 (!%p191_p9), %s215_s7, 6 }
  0x13   : > { %v1429_v0 = vld [vmem:[%s2060_s1 + $0x38] sm:$0xff]  ;;  %v1428_v1 = vld [vmem:[%s2060_s1 + $0x30] sm:$0xff]  ;;  %v1427_v2 = vld [vmem:[%s2060_s1 + $0x28] sm:$0xff]  ;;  %s219_s17 = scalar_select %p218_p10, %s1640_s22, 1  ;;  %vm541_vm0 = vcmask 130048   ;;  %v1582_v52 = vmov 0.0  }
  0x14   : > { %420 = vmatpush.bf16.msra.mxu0 %v1429_v0  ;;  %1440 = vmatpush.bf16.msra.mxu1 %v1429_v0  ;;  %v1426_v3 = vld [vmem:[%s2060_s1 + $0x20] sm:$0xff]  ;;  %v1425_v4 = vld [vmem:[%s2060_s1 + $0x18] sm:$0xff]  ;;  %v1424_v5 = vld [vmem:[%s2060_s1 + $0x10] sm:$0xff]  ;;  %575 = vst.msk [vmem:[#allocation3 + $0x8] sm:$0xff] %vm541_vm0, %v1582_v52  ;;  %vm620_vm1 = vcmask 130049   ;;  %vm664_vm2 = vcmask 261248  }
  0x15   : > { %1442 = vmatpush.bf16.msra.mxu3 %v1429_v0  ;;  %1441 = vmatpush.bf16.msra.mxu2 %v1429_v0  ;;  %v1423_v6 = vld [vmem:[%s2060_s1 + $0x8] sm:$0xff]  ;;  %s1405_s26 = sshll.u32 %s219_s17, 7  ;;  %v1422_v7 = vld [vmem:[%s2060_s1] sm:$0xff]  ;;  %574 = vst [vmem:[#allocation3] sm:$0xff] %v1582_v52  ;;  %vm707_vm3 = vcmask 392448   ;;  %vm764_vm4 = vcmask 523649  }
  0x16   : > { %s1696_s9 = scalar_lea.vmem %s2059_s0, %s1405_s26  ;;  %v1717_v24 = vld [vmem:[%s2062_s3] ss:$0 sm:$0xff]  ;;  %576 = vst [vmem:[#allocation3 + $0x10] sm:$0xff] %v1582_v52  ;;  %s1586_s26 = smov 96   ;;  %vm813_vm5 = vcmask 654848   ;;  %vm862_vm6 = vcmask 786048  }
  0x17   : > { %v1406_v8 = vld [vmem:[%s1696_s9] sm:$0xff]  ;;  %v1412_v9 = vld [vmem:[%s1696_s9 + $0x30] sm:$0xff]  ;;  %v1407_v12 = vld [vmem:[%s1696_s9 + $0x8] sm:$0xff]  ;;  %577 = vst.msk [vmem:[#allocation3 + $0x18] sm:$0xff] %vm541_vm0, %v1582_v52  ;;  %vm919_vm7 = vcmask 917249   ;;  %vm968_vm8 = vcmask 1048448  }
  0x18   : > { %421 = vmatpush.bf16.msra.mxu0 %v1428_v1  ;;  %1443 = vmatpush.bf16.msra.mxu1 %v1428_v1  ;;  %v1416_v10 = vld [vmem:[%s1696_s9 + $0x50] sm:$0xff]  ;;  %v1414_v11 = vld [vmem:[%s1696_s9 + $0x40] sm:$0xff]  ;;  %v1417_v13 = vld [vmem:[%s1696_s9 + $0x58] sm:$0xff]  ;;  %578 = vst [vmem:[#allocation3 + $0x20] sm:$0xff] %v1582_v52  ;;  %s1180_s22 = scalar_lea.sflag [#allocation5], %s215_s7 }
  0x19   : > { %1445 = vmatpush.bf16.msra.mxu3 %v1428_v1  ;;  %1444 = vmatpush.bf16.msra.mxu2 %v1428_v1  ;;  %v1415_v14 = vld [vmem:[%s1696_s9 + $0x48] sm:$0xff]  ;;  %v1408_v15 = vld [vmem:[%s1696_s9 + $0x10] sm:$0xff]  ;;  %v1418_v16 = vld [vmem:[%s1696_s9 + $0x60] sm:$0xff]  ;;  %579 = vst.msk [vmem:[#allocation3 + $0x28] sm:$0xff] %vm541_vm0, %v1582_v52 }
  0x1a   : > { %v1409_v17 = vld [vmem:[%s1696_s9 + $0x18] sm:$0xff]  ;;  %v1419_v18 = vld [vmem:[%s1696_s9 + $0x68] sm:$0xff]  ;;  %v1410_v20 = vld [vmem:[%s1696_s9 + $0x20] sm:$0xff]  ;;  %580 = vst [vmem:[#allocation3 + $0x30] sm:$0xff] %v1582_v52 }
  0x1b   : > { %v1413_v19 = vld [vmem:[%s1696_s9 + $0x38] sm:$0xff]  ;;  %v1420_v21 = vld [vmem:[%s1696_s9 + $0x70] sm:$0xff]  ;;  %v1411_v22 = vld [vmem:[%s1696_s9 + $0x28] sm:$0xff]  ;;  %581 = vst.msk [vmem:[#allocation3 + $0x38] sm:$0xff] %vm541_vm0, %v1582_v52 }
  0x1c   : > { %422 = vmatpush.bf16.msra.mxu0 %v1427_v2  ;;  %1446 = vmatpush.bf16.msra.mxu1 %v1427_v2  ;;  %v1421_v23 = vld [vmem:[%s1696_s9 + $0x78] sm:$0xff]  ;;  %582 = vst [vmem:[#allocation3 + $0x40] sm:$0xff] %v1582_v52  ;;  %s2007_s9 = scalar_lea.vmem [#allocation4], %s1261_s8 }
  0x1d   : > { %1448 = vmatpush.bf16.msra.mxu3 %v1427_v2  ;;  %1447 = vmatpush.bf16.msra.mxu2 %v1427_v2  ;;  %583 = vst.msk [vmem:[#allocation3 + $0x48] sm:$0xff] %vm541_vm0, %v1582_v52 }
  0x1e   : > { %584 = vst [vmem:[#allocation3 + $0x50] sm:$0xff] %v1582_v52 }
  0x1f   : > { %585 = vst.msk [vmem:[#allocation3 + $0x58] sm:$0xff] %vm541_vm0, %v1582_v52 }
  0x20   : > { %423 = vmatpush.bf16.msra.mxu0 %v1426_v3  ;;  %1449 = vmatpush.bf16.msra.mxu1 %v1426_v3  ;;  %586 = vst [vmem:[#allocation3 + $0x60] sm:$0xff] %v1582_v52 }
  0x21   : > { %1451 = vmatpush.bf16.msra.mxu3 %v1426_v3  ;;  %1450 = vmatpush.bf16.msra.mxu2 %v1426_v3  ;;  %587 = vst.msk [vmem:[#allocation3 + $0x68] sm:$0xff] %vm541_vm0, %v1582_v52 }
  0x22   : > { %588 = vst [vmem:[#allocation3 + $0x70] sm:$0xff] %v1582_v52 }
  0x23   : > { %589 = vst.msk [vmem:[#allocation3 + $0x78] sm:$0xff] %vm541_vm0, %v1582_v52 }
  0x24   : > { %424 = vmatpush.bf16.msra.mxu0 %v1425_v4  ;;  %1452 = vmatpush.bf16.msra.mxu1 %v1425_v4 }
  0x25   : > { %1454 = vmatpush.bf16.msra.mxu3 %v1425_v4  ;;  %1453 = vmatpush.bf16.msra.mxu2 %v1425_v4 }
  0x28   : > { %425 = vmatpush.bf16.msra.mxu0 %v1424_v5  ;;  %1455 = vmatpush.bf16.msra.mxu1 %v1424_v5 }
  0x29   : > { %1457 = vmatpush.bf16.msra.mxu3 %v1424_v5  ;;  %1456 = vmatpush.bf16.msra.mxu2 %v1424_v5 }
  0x2c   : > { %426 = vmatpush.bf16.msra.mxu0 %v1423_v6  ;;  %1458 = vmatpush.bf16.msra.mxu1 %v1423_v6 }
  0x2d   : > { %1460 = vmatpush.bf16.msra.mxu3 %v1423_v6  ;;  %1459 = vmatpush.bf16.msra.mxu2 %v1423_v6 }
  0x30   : > { %427 = vmatpush.bf16.msra.mxu0 %v1422_v7  ;;  %1461 = vmatpush.bf16.msra.mxu1 %v1422_v7 }
  0x31   : > { %1463 = vmatpush.bf16.msra.mxu3 %v1422_v7  ;;  %1462 = vmatpush.bf16.msra.mxu2 %v1422_v7 }
  0x33   : > { %428 = vmatmul.bf16.vlgmr.msra.gmra.mxu0 %v1406_v8  ;;  %458 = vmatmul.bf16.vlgmr.msra.gmra.mxu1 %v1412_v9 }
  0x34   : > { %478 = vmatmul.bf16.vlgmr.msra.gmra.mxu3 %v1416_v10  ;;  %468 = vmatmul.bf16.vlgmr.msra.gmra.mxu2 %v1414_v11 }
  0x43   : > { %433 = vmatmul.bf16.gmra.mxu0 %v1407_v12  ;;  %463 = vmatmul.bf16.gmra.mxu1 %v1413_v19 }
  0x44   : > { %483 = vmatmul.bf16.gmra.mxu3 %v1417_v13  ;;  %473 = vmatmul.bf16.gmra.mxu2 %v1415_v14 }
  0x53   : > { %438 = vmatmul.bf16.gmra.mxu0 %v1408_v15  ;;  %v1438_v15 = vld [vmem:[%s2061_s2 + $0x40] sm:$0xff] }
  0x54   : > { %488 = vmatmul.bf16.gmra.mxu3 %v1418_v16  ;;  %1141 = vmatpush.bf16.msrb.mxu2 %v1438_v15 }
  0x63   : > { %443 = vmatmul.bf16.gmra.mxu0 %v1409_v17 }
  0x64   : > { %493 = vmatmul.bf16.gmra.mxu3 %v1419_v18 }
  0x73   : > { %448 = vmatmul.bf16.gmra.mxu0 %v1410_v20 }
  0x74   : > { %498 = vmatmul.bf16.gmra.mxu3 %v1420_v21 }
  0x83   : > { %453 = vmatmul.bf16.gmra.mxu0 %v1411_v22 }
  0x84   : > { %503 = vmatmul.bf16.gmra.mxu3 %v1421_v23 }
  0xb0   : > { %v429_v25 = vpop.f32.mrf.mxu0  ;;  %v459_v26 = vpop.f32.mrf.mxu1 }
  0xb1   : > { %v430_v27 = vadd.f32 %v1717_v24, %v429_v25  ;;  %v460_v28 = vadd.f32 %v1717_v24, %v459_v26 }
  0xb3   : > { %v509_v29 = vmax.f32 %v430_v27, 0.0  ;;  %v521_v30 = vmax.f32 %v460_v28, 0.0 }
  0xb5   : > { %542 = vst.msk [vmem:[#allocation2] sm:$0xff] %vm541_vm0, %v509_v29 }
  0xb6   : > { %554 = vst.msk [vmem:[#allocation2 + $0x60] sm:$0xff] %vm541_vm0, %v521_v30 }
  0xb7   : > { %v479_v31 = vpop.f32.mrf.mxu3  ;;  %v469_v32 = vpop.f32.mrf.mxu2 }
  0xb8   : > { %v480_v33 = vadd.f32 %v1717_v24, %v479_v31  ;;  %v470_v34 = vadd.f32 %v1717_v24, %v469_v32  ;;  %v431_v35 = vpop.f32.mrf.mxu0  ;;  %v461_v36 = vpop.f32.mrf.mxu1 }
  0xb9   : > { %v432_v37 = vadd.f32 %v1717_v24, %v431_v35  ;;  %v462_v38 = vadd.f32 %v1717_v24, %v461_v36 }
  0xba   : > { %v529_v39 = vmax.f32 %v480_v33, 0.0  ;;  %v525_v40 = vmax.f32 %v470_v34, 0.0 }
  0xbb   : > { %v510_v41 = vmax.f32 %v432_v37, 0.0  ;;  %v522_v42 = vmax.f32 %v462_v38, 0.0 }
  0xbc   : > { %562 = vst.msk [vmem:[#allocation2 + $0xa0] sm:$0xff] %vm541_vm0, %v529_v39  ;;  %v773_v43 = vld [vmem:[#allocation2] sm:$0xff] }
  0xbd   : > { %558 = vst.msk [vmem:[#allocation2 + $0x80] sm:$0xff] %vm541_vm0, %v525_v40  ;;  %v826_v44 = vld [vmem:[#allocation2 + $0x60] sm:$0xff]  ;;  %789 = vrot.lane.b32.xlu2 %v773_v43, %s1579_s12 }
  0xbe   : > { %v720_v45 = vld [vmem:[#allocation2 + $0x60] sm:$0x7f]  ;;  %543 = vst.msk [vmem:[#allocation2 + $0x8] sm:$0xff] %vm541_vm0, %v510_v41  ;;  %846 = vrot.lane.b32.xlu1 %v826_v44, %s1580_s13 }
  0xbf   : > { %v736_v46 = vrot.slane %v720_v45, 7  ;;  %555 = vst.msk [vmem:[#allocation2 + $0x68] sm:$0xff] %vm541_vm0, %v522_v42  ;;  %v481_v47 = vpop.f32.mrf.mxu3  ;;  %v471_v48 = vpop.f32.mrf.mxu2 }
  0xc0   : > { %v482_v49 = vadd.f32 %v1717_v24, %v481_v47  ;;  %v472_v50 = vadd.f32 %v1717_v24, %v471_v48  ;;  %v434_v51 = vpop.f32.mrf.mxu0 }
  0xc1   : > { %748 = vrot.lane.b32.xlu0 %v736_v46, %s1581_s14  ;;  %v435_v53 = vadd.f32 %v1717_v24, %v434_v51 }
  0xc2   : > { %v530_v54 = vmax.f32 %v482_v49, 0.0  ;;  %v526_v55 = vmax.f32 %v472_v50, 0.0 }
  0xc3   : > { %v511_v56 = vmax.f32 %v435_v53, 0.0  ;;  %v932_v58 = vld [vmem:[#allocation2 + $0xa0] sm:$0xff] }
  0xc4   : > { %563 = vst.msk [vmem:[#allocation2 + $0xa8] sm:$0xff] %vm541_vm0, %v530_v54  ;;  %v928_v57 = vld [vmem:[#allocation2 + $0x80] sm:$0xff] }
  0xc5   : > { %559 = vst.msk [vmem:[#allocation2 + $0x88] sm:$0xff] %vm541_vm0, %v526_v55  ;;  %952 = vrot.lane.b32.xlu2 %v932_v58, %s1583_s15  ;;  %v774_v6 = vld [vmem:[#allocation2 + $0x8] sm:$0xff] }
  0xc6   : > { %544 = vst.msk [vmem:[#allocation2 + $0x10] sm:$0xff] %vm541_vm0, %v511_v56  ;;  %944 = vrot.lane.b32.xlu1 %v928_v57, %s1583_s15  ;;  %v721_v1 = vld [vmem:[#allocation2 + $0x68] sm:$0x7f] }
  0xc7   : > { %v484_v59 = vpop.f32.mrf.mxu3  ;;  %v474_v60 = vpop.f32.mrf.mxu2  ;;  %v737_v5 = vrot.slane %v721_v1, 7  ;;  %v827_v17 = vld [vmem:[#allocation2 + $0x68] sm:$0xff] }
  0xc8   : > { %v485_v61 = vadd.f32 %v1717_v24, %v484_v59  ;;  %v436_v62 = vpop.f32.mrf.mxu0  ;;  %v475_v63 = vadd.f32 %v1717_v24, %v474_v60 }
  0xc9   : > { %643 = vrot.lane.b32.xlu0 %v928_v57, %s1584_s16  ;;  %v437_v0 = vadd.f32 %v1717_v24, %v436_v62 }
  0xca   : > { %v531_v2 = vmax.f32 %v485_v61, 0.0  ;;  %v527_v3 = vmax.f32 %v475_v63, 0.0 }
  0xcb   : > { %v512_v4 = vmax.f32 %v437_v0, 0.0 }
  0xcc   : > { %564 = vst.msk [vmem:[#allocation2 + $0xb0] sm:$0xff] %vm541_vm0, %v531_v2  ;;  %v630_v20 = vld [vmem:[#allocation2 + $0x88] sm:$0xff] }
  0xcd   : > { %545 = vst.msk [vmem:[#allocation2 + $0x18] sm:$0xff] %vm541_vm0, %v512_v4  ;;  %791 = vrot.lane.b32.xlu2 %v774_v6, %s1579_s12  ;;  %v775_v29 = vld [vmem:[#allocation2 + $0x10] sm:$0xff] }
  0xce   : > { %560 = vst.msk [vmem:[#allocation2 + $0x90] sm:$0xff] %vm541_vm0, %v527_v3  ;;  %750 = vrot.lane.b32.xlu1 %v737_v5, %s1581_s14  ;;  %v464_v5 = vpop.f32.mrf.mxu1 }
  0xcf   : > { %v486_v7 = vpop.f32.mrf.mxu3  ;;  %v476_v8 = vpop.f32.mrf.mxu2 }
  0xd0   : > { %v487_v9 = vadd.f32 %v1717_v24, %v486_v7  ;;  %v439_v10 = vpop.f32.mrf.mxu0  ;;  %v477_v11 = vadd.f32 %v1717_v24, %v476_v8  ;;  %v465_v7 = vadd.f32 %v1717_v24, %v464_v5 }
  0xd1   : > { %651 = vrot.lane.b32.xlu0 %v932_v58, %s1584_s16  ;;  %v440_v12 = vadd.f32 %v1717_v24, %v439_v10 }
  0xd2   : > { %v532_v13 = vmax.f32 %v487_v9, 0.0  ;;  %v528_v14 = vmax.f32 %v477_v11, 0.0  ;;  %v523_v11 = vmax.f32 %v465_v7, 0.0 }
  0xd3   : > { %v513_v16 = vmax.f32 %v440_v12, 0.0  ;;  %v635_v7 = vld [vmem:[#allocation2 + $0xb0] sm:$0xff] }
  0xd4   : > { %565 = vst.msk [vmem:[#allocation2 + $0xb8] sm:$0xff] %vm541_vm0, %v532_v13  ;;  %v776_v27 = vld [vmem:[#allocation2 + $0x18] sm:$0xff] }
  0xd5   : > { %546 = vst.msk [vmem:[#allocation2 + $0x20] sm:$0xff] %vm541_vm0, %v513_v16  ;;  %v631_v18 = vld [vmem:[#allocation2 + $0x90] sm:$0xff]  ;;  %848 = vrot.lane.b32.xlu2 %v827_v17, %s1580_s13 }
  0xd6   : > { %561 = vst.msk [vmem:[#allocation2 + $0x98] sm:$0xff] %vm541_vm0, %v528_v14  ;;  %647 = vrot.lane.b32.xlu1 %v631_v18, %s1584_s16 }
  0xd7   : > { %v489_v19 = vpop.f32.mrf.mxu3  ;;  %556 = vst.msk [vmem:[#allocation2 + $0x70] sm:$0xff] %vm541_vm0, %v523_v11  ;;  %v933_v11 = vld [vmem:[#allocation2 + $0xa8] sm:$0xff] }
  0xd8   : > { %v490_v21 = vadd.f32 %v1717_v24, %v489_v19  ;;  %v441_v22 = vpop.f32.mrf.mxu0 }
  0xd9   : > { %645 = vrot.lane.b32.xlu0 %v630_v20, %s1584_s16  ;;  %v442_v23 = vadd.f32 %v1717_v24, %v441_v22 }
  0xda   : > { %v533_v25 = vmax.f32 %v490_v21, 0.0  ;;  %v466_v21 = vpop.f32.mrf.mxu1 }
  0xdb   : > { %v514_v26 = vmax.f32 %v442_v23, 0.0  ;;  %v467_v23 = vadd.f32 %v1717_v24, %v466_v21 }
  0xdc   : > { %566 = vst.msk [vmem:[#allocation2 + $0xc0] sm:$0xff] %vm541_vm0, %v533_v25  ;;  %v777_v46 = vld [vmem:[#allocation2 + $0x20] sm:$0xff] }
  0xdd   : > { %547 = vst.msk [vmem:[#allocation2 + $0x28] sm:$0xff] %vm541_vm0, %v514_v26  ;;  %946 = vrot.lane.b32.xlu2 %v630_v20, %s1583_s15  ;;  %v931_v37 = vld [vmem:[#allocation2 + $0x98] sm:$0xff] }
  0xde   : > { %795 = vrot.lane.b32.xlu1 %v776_v27, %s1579_s12 }
  0xdf   : > { %v491_v28 = vpop.f32.mrf.mxu3 }
  0xe0   : > { %v492_v30 = vadd.f32 %v1717_v24, %v491_v28  ;;  %v444_v31 = vpop.f32.mrf.mxu0 }
  0xe1   : > { %793 = vrot.lane.b32.xlu0 %v775_v29, %s1579_s12  ;;  %v445_v32 = vadd.f32 %v1717_v24, %v444_v31 }
  0xe2   : > { %v534_v33 = vmax.f32 %v492_v30, 0.0  ;;  %v524_v30 = vmax.f32 %v467_v23, 0.0 }
  0xe3   : > { %v977_v34 = vld [vmem:[#allocation2 + $0xc0] sm:$0xff]  ;;  %v515_v35 = vmax.f32 %v445_v32, 0.0 }
  0xe4   : > { %v591_v36 = vld [vmem:[#allocation2 + $0xc0] sm:$0x7f]  ;;  %985 = vst.msk [vmem:[#allocation3 + $0x8] sm:$0xff] %vm541_vm0, %v977_v34  ;;  %v778_v2 = vld [vmem:[#allocation2 + $0x28] sm:$0xff] }
  0xe5   : > { %v605_v38 = vrot.slane %v591_v36, 7  ;;  %567 = vst.msk [vmem:[#allocation2 + $0xc8] sm:$0xff] %vm541_vm0, %v534_v33  ;;  %649 = vrot.lane.b32.xlu2 %v931_v37, %s1584_s16  ;;  %v871_v50 = vld [vmem:[#allocation2 + $0xc0] sm:$0x7f] }
  0xe6   : > { %548 = vst.msk [vmem:[#allocation2 + $0x30] sm:$0xff] %vm541_vm0, %v515_v35  ;;  %950 = vrot.lane.b32.xlu1 %v931_v37, %s1583_s15  ;;  %v887_v55 = vrot.slane %v871_v50, 7 }
  0xe7   : > { %v494_v39 = vpop.f32.mrf.mxu3  ;;  %621 = vst.msk [vmem:[#allocation3 + $0x10] sm:$0xfe] %vm620_vm1, %v605_v38 }
  0xe8   : > { %v495_v40 = vadd.f32 %v1717_v24, %v494_v39  ;;  %v446_v41 = vpop.f32.mrf.mxu0  ;;  %557 = vst.msk [vmem:[#allocation2 + $0x78] sm:$0xff] %vm541_vm0, %v524_v30 }
  0xe9   : > { %948 = vrot.lane.b32.xlu0 %v631_v18, %s1583_s15  ;;  %v447_v42 = vadd.f32 %v1717_v24, %v446_v41 }
  0xea   : > { %v535_v43 = vmax.f32 %v495_v40, 0.0 }
  0xeb   : > { %v516_v44 = vmax.f32 %v447_v42, 0.0  ;;  %v994_v60 = vld [vmem:[#allocation3 + $0x8] sm:$0xff] }
  0xec   : > { %v978_v45 = vld [vmem:[#allocation2 + $0xc8] sm:$0xff]  ;;  %568 = vst.msk [vmem:[#allocation2 + $0xd0] sm:$0xff] %vm541_vm0, %v535_v43 }
  0xed   : > { %v592_v47 = vld [vmem:[#allocation2 + $0xc8] sm:$0x7f]  ;;  %986 = vst.msk [vmem:[#allocation3 + $0x18] sm:$0xff] %vm541_vm0, %v978_v45  ;;  %797 = vrot.lane.b32.xlu2 %v777_v46, %s1579_s12 }
  0xee   : > { %v606_v48 = vrot.slane %v592_v47, 7  ;;  %549 = vst.msk [vmem:[#allocation2 + $0x38] sm:$0xff] %vm541_vm0, %v516_v44  ;;  %v872_v10 = vld [vmem:[#allocation2 + $0xc8] sm:$0x7f] }
  0xef   : > { %v496_v49 = vpop.f32.mrf.mxu3  ;;  %v888_v15 = vrot.slane %v872_v10, 7  ;;  %v722_v10 = vld [vmem:[#allocation2 + $0x70] sm:$0x7f] }
  0xf0   : > { %622 = vst.msk [vmem:[#allocation3 + $0x20] sm:$0xfe] %vm620_vm1, %v606_v48  ;;  %v497_v51 = vadd.f32 %v1717_v24, %v496_v49  ;;  %v449_v52 = vpop.f32.mrf.mxu0 }
  0xf1   : > { %686 = vrot.lane.b32.xlu0 %v977_v34, %s1585_s25  ;;  %v450_v53 = vadd.f32 %v1717_v24, %v449_v52 }
  0xf2   : > { %v536_v54 = vmax.f32 %v497_v51, 0.0 }
  0xf3   : > { %v1814_v56 = vld [vmem:[#allocation2 + $0xd0] sm:$0xff]  ;;  %v517_v57 = vmax.f32 %v450_v53, 0.0 }
  0xf4   : > { %v873_v58 = vld [vmem:[#allocation2 + $0xd0] sm:$0x7f]  ;;  %987 = vst.msk [vmem:[#allocation3 + $0x28] sm:$0xff] %vm541_vm0, %v1814_v56  ;;  %v996_v61 = vld [vmem:[#allocation3 + $0x18] sm:$0xff] }
  0xf5   : > { %v593_v59 = vld [vmem:[#allocation2 + $0xd0] sm:$0x7f]  ;;  %v889_v62 = vrot.slane %v873_v58, 7  ;;  %569 = vst.msk [vmem:[#allocation2 + $0xd8] sm:$0xff] %vm541_vm0, %v536_v54  ;;  %v1010_v0 = vpack.c.bf16 %v996_v61, %v994_v60  ;;  %895 = vrot.lane.b32.xlu2 %v887_v55, %s1586_s26 }
  0xf6   : > { %v607_v63 = vrot.slane %v593_v59, 7  ;;  %550 = vst.msk [vmem:[#allocation2 + $0x40] sm:$0xff] %vm541_vm0, %v517_v57 }
  0xf7   : > { %899 = vrot.lane.b32.xlu1 %v889_v62, %s1586_s26  ;;  %1396 = vmatmul.msk.bf16.vlgmr.msrb.gmra.mxu2 %vm541_vm0, %v1010_v0  ;;  %v499_v1 = vpop.f32.mrf.mxu3 }
  0xf8   : > { %623 = vst.msk [vmem:[#allocation3 + $0x30] sm:$0xfe] %vm620_vm1, %v607_v63  ;;  %v500_v3 = vadd.f32 %v1717_v24, %v499_v1  ;;  %v451_v4 = vpop.f32.mrf.mxu0 }
  0xf9   : > { %799 = vrot.lane.b32.xlu0 %v778_v2, %s1579_s12  ;;  %v452_v6 = vadd.f32 %v1717_v24, %v451_v4 }
  0xfa   : > { %v537_v8 = vmax.f32 %v500_v3, 0.0 }
  0xfb   : > { %v518_v9 = vmax.f32 %v452_v6, 0.0  ;;  %v998_v31 = vld [vmem:[#allocation3 + $0x28] sm:$0xff] }
  0xfc   : > { %v980_v12 = vld [vmem:[#allocation2 + $0xd8] sm:$0xff]  ;;  %570 = vst.msk [vmem:[#allocation2 + $0xe0] sm:$0xff] %vm541_vm0, %v537_v8 }
  0xfd   : > { %v594_v13 = vld [vmem:[#allocation2 + $0xd8] sm:$0x7f]  ;;  %988 = vst.msk [vmem:[#allocation3 + $0x38] sm:$0xff] %vm541_vm0, %v980_v12  ;;  %688 = vrot.lane.b32.xlu2 %v978_v45, %s1585_s25  ;;  %v716_v17 = vld [vmem:[#allocation2 + $0x40] sm:$0x7f] }
  0xfe   : > { %v608_v14 = vrot.slane %v594_v13, 7  ;;  %551 = vst.msk [vmem:[#allocation2 + $0x48] sm:$0xff] %vm541_vm0, %v518_v9  ;;  %v874_v19 = vld [vmem:[#allocation2 + $0xd8] sm:$0x7f]  ;;  %v732_v26 = vrot.slane %v716_v17, 7  ;;  %v822_v45 = vld [vmem:[#allocation2 + $0x40] sm:$0xff] }
  0xff   : > { %692 = vrot.lane.b32.xlu1 %v980_v12, %s1585_s25  ;;  %v501_v16 = vpop.f32.mrf.mxu3  ;;  %v890_v28 = vrot.slane %v874_v19, 7  ;;  %v738_v13 = vrot.slane %v722_v10, 7  ;;  %v723_v17 = vld [vmem:[#allocation2 + $0x78] sm:$0x7f] }
 0x100   : > { %v502_v18 = vadd.f32 %v1717_v24, %v501_v16  ;;  %v454_v20 = vpop.f32.mrf.mxu0  ;;  %624 = vst.msk [vmem:[#allocation3 + $0x40] sm:$0xfe] %vm620_vm1, %v608_v14  ;;  %v739_v19 = vrot.slane %v723_v17, 7 }
 0x101   : > { %897 = vrot.lane.b32.xlu0 %v888_v15, %s1586_s26  ;;  %v455_v22 = vadd.f32 %v1717_v24, %v454_v20 }
 0x102   : > { %v538_v25 = vmax.f32 %v502_v18, 0.0  ;;  %v780_v18 = vld [vmem:[#allocation2 + $0x38] sm:$0xff] }
 0x103   : > { %v981_v27 = vld [vmem:[#allocation2 + $0xe0] sm:$0xff]  ;;  %v519_v29 = vmax.f32 %v455_v22, 0.0 }
 0x104   : > { %989 = vst.msk [vmem:[#allocation3 + $0x48] sm:$0xff] %vm541_vm0, %v981_v27  ;;  %v1000_v32 = vld [vmem:[#allocation3 + $0x38] sm:$0xff]  ;;  %v595_v33 = vld [vmem:[#allocation2 + $0xe0] sm:$0x7f] }
 0x105   : > { %571 = vst.msk [vmem:[#allocation2 + $0xe8] sm:$0xff] %vm541_vm0, %v538_v25  ;;  %v1012_v34 = vpack.c.bf16 %v1000_v32, %v998_v31  ;;  %901 = vrot.lane.b32.xlu2 %v890_v28, %s1586_s26  ;;  %v609_v35 = vrot.slane %v595_v33, 7  ;;  %v823_v43 = vld [vmem:[#allocation2 + $0x48] sm:$0xff]  ;;  %v875_v53 = vld [vmem:[#allocation2 + $0xe0] sm:$0x7f]  ;;  %v935_v32 = vld [vmem:[#allocation2 + $0xb8] sm:$0xff] }
 0x106   : > { %552 = vst.msk [vmem:[#allocation2 + $0x50] sm:$0xff] %vm541_vm0, %v519_v29  ;;  %v717_v49 = vld [vmem:[#allocation2 + $0x48] sm:$0x7f]  ;;  %v829_v33 = vld [vmem:[#allocation2 + $0x78] sm:$0xff] }
 0x107   : > { %740 = vrot.lane.b32.xlu1 %v732_v26, %s1581_s14  ;;  %1397 = vmatmul.msk.bf16.gmra.mxu2 %vm541_vm0, %v1012_v34  ;;  %v504_v36 = vpop.f32.mrf.mxu3  ;;  %625 = vst.msk [vmem:[#allocation3 + $0x50] sm:$0xfe] %vm620_vm1, %v609_v35  ;;  %v779_v26 = vld [vmem:[#allocation2 + $0x30] sm:$0xff] }
 0x108   : > { %v456_v37 = vpop.f32.mrf.mxu0  ;;  %v505_v38 = vadd.f32 %v1717_v24, %v504_v36 }
 0x109   : > { %690 = vrot.lane.b32.xlu0 %v1814_v56, %s1585_s25  ;;  %v457_v39 = vadd.f32 %v1717_v24, %v456_v37  ;;  %v733_v56 = vrot.slane %v717_v49, 7  ;;  %v1434_v49 = vld [vmem:[%s2061_s2 + $0x20] sm:$0xff] }
 0x10a   : > { %v539_v40 = vmax.f32 %v505_v38, 0.0 }
 0x10b   : > { %v520_v41 = vmax.f32 %v457_v39, 0.0  ;;  %v1002_v50 = vld [vmem:[#allocation3 + $0x48] sm:$0xff] }
 0x10c   : > { %v982_v42 = vld [vmem:[#allocation2 + $0xe8] sm:$0xff]  ;;  %572 = vst.msk [vmem:[#allocation2 + $0xf0] sm:$0xff] %vm541_vm0, %v539_v40  ;;  %v1437_v40 = vld [vmem:[%s2061_s2 + $0x38] sm:$0xff] }
 0x10d   : > { %990 = vst.msk [vmem:[#allocation3 + $0x58] sm:$0xff] %vm541_vm0, %v982_v42  ;;  %694 = vrot.lane.b32.xlu2 %v981_v27, %s1585_s25  ;;  %v596_v44 = vld [vmem:[#allocation2 + $0xe8] sm:$0x7f]  ;;  %v824_v51 = vld [vmem:[#allocation2 + $0x50] sm:$0xff]  ;;  %1105 = vmatpush.bf16.msrb.mxu1 %v1437_v40 }
 0x10e   : > { %553 = vst.msk [vmem:[#allocation2 + $0x58] sm:$0xff] %vm541_vm0, %v520_v41  ;;  %v610_v47 = vrot.slane %v596_v44, 7  ;;  %v876_v62 = vld [vmem:[#allocation2 + $0xe8] sm:$0x7f]  ;;  %v718_v4 = vld [vmem:[#allocation2 + $0x50] sm:$0x7f] }
 0x10f   : > { %840 = vrot.lane.b32.xlu1 %v823_v43, %s1580_s13  ;;  %v506_v46 = vpop.f32.mrf.mxu3  ;;  %v892_v0 = vrot.slane %v876_v62, 7  ;;  %v734_v6 = vrot.slane %v718_v4, 7  ;;  %v828_v27 = vld [vmem:[#allocation2 + $0x70] sm:$0xff] }
 0x110   : > { %v507_v48 = vadd.f32 %v1717_v24, %v506_v46  ;;  %626 = vst.msk [vmem:[#allocation3 + $0x60] sm:$0xfe] %vm620_vm1, %v610_v47  ;;  %v891_v24 = vrot.slane %v875_v53, 7  ;;  %v1436_v44 = vld [vmem:[%s2061_s2 + $0x30] sm:$0xff] }
 0x111   : > { %838 = vrot.lane.b32.xlu0 %v822_v45, %s1580_s13  ;;  %1106 = vmatpush.bf16.msrb.mxu1 %v1436_v44  ;;  %v1435_v45 = vld [vmem:[%s2061_s2 + $0x28] sm:$0xff] }
 0x112   : > { %v540_v52 = vmax.f32 %v507_v48, 0.0 }
 0x113   : > { %v983_v54 = vld [vmem:[#allocation2 + $0xf0] sm:$0xff] }
 0x114   : > { %v1004_v55 = vld [vmem:[#allocation3 + $0x58] sm:$0xff]  ;;  %991 = vst.msk [vmem:[#allocation3 + $0x68] sm:$0xff] %vm541_vm0, %v983_v54  ;;  %v597_v60 = vld [vmem:[#allocation2 + $0xf0] sm:$0x7f] }
 0x115   : > { %v1014_v57 = vpack.c.bf16 %v1004_v55, %v1002_v50  ;;  %842 = vrot.lane.b32.xlu2 %v824_v51, %s1580_s13  ;;  %573 = vst.msk [vmem:[#allocation2 + $0xf8] sm:$0xff] %vm541_vm0, %v540_v52  ;;  %v719_v58 = vld [vmem:[#allocation2 + $0x58] sm:$0x7f]  ;;  %v611_v61 = vrot.slane %v597_v60, 7  ;;  %v877_v22 = vld [vmem:[#allocation2 + $0xf0] sm:$0x7f]  ;;  %1107 = vmatpush.bf16.msrb.mxu1 %v1435_v45 }
 0x116   : > { %v735_v63 = vrot.slane %v719_v58, 7  ;;  %v825_v2 = vld [vmem:[#allocation2 + $0x58] sm:$0xff]  ;;  %v893_v25 = vrot.slane %v877_v22, 7  ;;  %v1430_v58 = vld [vmem:[%s2061_s2] sm:$0xff] }
 0x117   : > { %742 = vrot.lane.b32.xlu1 %v733_v56, %s1581_s14  ;;  %1398 = vmatmul.msk.bf16.gmra.mxu2 %vm541_vm0, %v1014_v57  ;;  %v1864_v59 = vpop.permute.xlu2 %789  ;;  %627 = vst.msk [vmem:[#allocation3 + $0x70] sm:$0xfe] %vm620_vm1, %v611_v61  ;;  %v1433_v50 = vld [vmem:[%s2061_s2 + $0x18] sm:$0xff]  ;;  %v1431_v56 = vld [vmem:[%s2061_s2 + $0x8] sm:$0xff] }
 0x119   : > { %903 = vrot.lane.b32.xlu0 %v891_v24, %s1586_s26  ;;  %1108 = vmatpush.bf16.msrb.mxu1 %v1434_v49 }
 0x11b   : > { %v1006_v5 = vld [vmem:[#allocation3 + $0x68] sm:$0xff] }
 0x11c   : > { %v984_v1 = vld [vmem:[#allocation2 + $0xf8] sm:$0xff] }
 0x11d   : > { %746 = vrot.lane.b32.xlu2 %v735_v63, %s1581_s14  ;;  %992 = vst.msk [vmem:[#allocation3 + $0x78] sm:$0xff] %vm541_vm0, %v984_v1  ;;  %v878_v31 = vld [vmem:[#allocation2 + $0xf8] sm:$0x7f]  ;;  %1109 = vmatpush.bf16.msrb.mxu1 %v1433_v50 }
 0x11e   : > { %v894_v34 = vrot.slane %v878_v31, 7 }
 0x11f   : > { %905 = vrot.lane.b32.xlu1 %v892_v0, %s1586_s26  ;;  %v1871_v3 = vpop.permute.xlu2 %952 }
 0x121   : > { %844 = vrot.lane.b32.xlu0 %v825_v2, %s1580_s13 }
 0x124   : > { %v1008_v8 = vld [vmem:[#allocation3 + $0x78] sm:$0xff] }
 0x125   : > { %655 = vrot.lane.b32.xlu2 %v635_v7, %s1584_s16  ;;  %v1016_v9 = vpack.c.bf16 %v1008_v8, %v1006_v5 }
 0x127   : > { %744 = vrot.lane.b32.xlu1 %v734_v6, %s1581_s14  ;;  %v1876_v12 = vpop.permute.xlu2 %791  ;;  %1399 = vmatmul.msk.bf16.gmra.mxu2 %vm541_vm0, %v1016_v9 }
 0x129   : > { %954 = vrot.lane.b32.xlu0 %v933_v11, %s1583_s15 }
 0x12d   : > { %752 = vrot.lane.b32.xlu2 %v738_v13, %s1581_s14 }
 0x12f   : > { %653 = vrot.lane.b32.xlu1 %v933_v11, %s1584_s16  ;;  %v1882_v14 = vpop.permute.xlu2 %848 }
 0x130   : > { %v1884_v15 = vpop.permute.xlu1 %846 }
 0x131   : > { %696 = vrot.lane.b32.xlu0 %v982_v42, %s1585_s25 }
 0x133   : > { %v1887_v16 = vpop.permute.xlu0 %748 }
 0x135   : > { %803 = vrot.lane.b32.xlu2 %v780_v18, %s1579_s12 }
 0x137   : > { %698 = vrot.lane.b32.xlu1 %v983_v54, %s1585_s25  ;;  %v1891_v20 = vpop.permute.xlu2 %946  ;;  %v1432_v54 = vld [vmem:[%s2061_s2 + $0x10] sm:$0xff] }
 0x138   : > { %v1893_v21 = vpop.permute.xlu1 %944  ;;  %1110 = vmatpush.bf16.msrb.mxu1 %v1432_v54 }
 0x139   : > { %754 = vrot.lane.b32.xlu0 %v739_v19, %s1581_s14  ;;  %s1192_s14 = sshll.u32 %s2007_s9, 4  ;;  %s1193_s14 = int_to_ptr.vmem [resolvable:$true] %s1192_s14 }
 0x13b   : > { %v644_v23 = vpop.permute.xlu0 %643 }
 0x13c   : > { %665 = vst.msk [vmem:[#allocation3 + $0x10] sm:$0xff] %vm664_vm2, %v644_v23  ;;  %1111 = vmatpush.bf16.msrb.mxu1 %v1431_v56 }
 0x13d   : > { %907 = vrot.lane.b32.xlu2 %v893_v25, %s1586_s26 }
 0x13f   : > { %801 = vrot.lane.b32.xlu1 %v779_v26, %s1579_s12  ;;  %v650_v28 = vpop.permute.xlu2 %649 }
 0x140   : > { %v751_v29 = vpop.permute.xlu1 %750  ;;  %668 = vst.msk [vmem:[#allocation3 + $0x40] sm:$0xff] %vm664_vm2, %v650_v28  ;;  %1112 = vmatpush.bf16.msrb.mxu1 %v1430_v58 }
 0x141   : > { %850 = vrot.lane.b32.xlu0 %v828_v27, %s1580_s13 }
 0x143   : > { %v652_v30 = vpop.permute.xlu0 %651 }
 0x144   : > { %669 = vst.msk [vmem:[#allocation3 + $0x50] sm:$0xff] %vm664_vm2, %v652_v30 }
 0x145   : > { %958 = vrot.lane.b32.xlu2 %v935_v32, %s1583_s15 }
 0x147   : > { %852 = vrot.lane.b32.xlu1 %v829_v33, %s1580_s13  ;;  %v798_v35 = vpop.permute.xlu2 %797  ;;  %s1191_s13 = scalar_lea.hbm %s2064_s5, %s1439_s10 }
 0x148   : > { %v648_v36 = vpop.permute.xlu1 %647 }
 0x149   : > { %909 = vrot.lane.b32.xlu0 %v894_v34, %s1586_s26  ;;  %667 = vst.msk [vmem:[#allocation3 + $0x30] sm:$0xff] %vm664_vm2, %v648_v36  ;;  %v1514_v34 = vld [vmem:[%s2063_s4] ss:$0 sm:$0xff]  ;;  %s1535_s26 = scalar_lea.hbm %s2064_s5, 128 }
 0x14b   : > { %v646_v37 = vpop.permute.xlu0 %645 }
 0x14c   : > { %666 = vst.msk [vmem:[#allocation3 + $0x20] sm:$0xff] %vm664_vm2, %v646_v37 }
 0x14f   : > { %956 = vrot.lane.b32.xlu1 %v635_v7, %s1583_s15  ;;  %v896_v38 = vpop.permute.xlu2 %895  ;;  %s1194_s15 = sshll.u32 %s1191_s13, 4  ;;  %s1195_s15 = int_to_ptr.hbm [resolvable:$true] %s1194_s15 }
 0x150   : > { %v796_v41 = vpop.permute.xlu1 %795  ;;  %s1529_s16 = sshra.s32 %s1195_s15, 4  ;;  %s1530_s16 = int_to_ptr.hbm [resolvable:$true] %s1529_s16 }
 0x151   : > { %s1531_s17 = scalar_lea.hbm %s1530_s16, 64  ;;  %p1536_p0 = scmp.lt.s32.totalorder %s1530_s16, %s2064_s5 }
 0x152   : > { %p1532_p11 = scmp.ne.s32.totalorder %s1530_s16, %s1531_s17  ;;  %p1537_p1 = scmp.lt.s32.totalorder %s1535_s26, %s1531_s17 }
 0x153   : > { %v1908_v39 = vpop.permute.xlu0 %793 }
 0x154   : > { %p1533_p12 = pnand %p1532_p11, %p1657_p5  ;;  %p1538_p2 = por %p1537_p1, %p1536_p0 }
 0x156   : > { %p1534_p13 = pneg %p1533_p12 }
 0x157   : > { %v689_v42 = vpop.permute.xlu2 %688 }
 0x158   : > { %709 = vst.msk [vmem:[#allocation3 + $0x20] sm:$0xff] %vm707_vm3, %v689_v42  ;;  %v1922_v47 = vpop.permute.xlu1 %950  ;;  %p1539_p3 = pnand %p1538_p2, %p1534_p13 }
 0x15b   : > { %v1914_v43 = vpop.permute.xlu0 %948 }
 0x15f   : > { %v902_v46 = vpop.permute.xlu2 %901 }
 0x163   : > { %v687_v48 = vpop.permute.xlu0 %686 }
 0x164   : > { %708 = vst.msk [vmem:[#allocation3 + $0x10] sm:$0xff] %vm707_vm3, %v687_v48 }
 0x167   : > { %v695_v51 = vpop.permute.xlu2 %694 }
 0x168   : > { %712 = vst.msk [vmem:[#allocation3 + $0x50] sm:$0xff] %vm707_vm3, %v695_v51 }
 0x169   : > { %v1931_v52 = vpop.permute.xlu1 %899  ;;  %770 = vst.msk [vmem:[#allocation3 + $0x50] sm:$0xfe] %vm764_vm4, %v751_v29 }
 0x16b   : > { %v800_v53 = vpop.permute.xlu0 %799 }
 0x16c   : > { %819 = vst.msk [vmem:[#allocation3 + $0x50] sm:$0xff] %vm813_vm5, %v800_v53 }
 0x16d   : > { %868 = vst.msk [vmem:[#allocation3 + $0x50] sm:$0xff] %vm862_vm6, %v1882_v14 }
 0x16f   : > { %v843_v55 = vpop.permute.xlu2 %842 }
 0x171   : > { %v693_v57 = vpop.permute.xlu1 %692 }
 0x172   : > { %711 = vst.msk [vmem:[#allocation3 + $0x40] sm:$0xff] %vm707_vm3, %v693_v57 }
 0x173   : > { %769 = vst.msk [vmem:[#allocation3 + $0x40] sm:$0xfe] %vm764_vm4, %v1887_v16  ;;  %v898_v24 = vpop.permute.xlu0 %897 }
 0x174   : > { %818 = vst.msk [vmem:[#allocation3 + $0x40] sm:$0xff] %vm813_vm5, %v798_v35 }
 0x175   : > { %867 = vst.msk [vmem:[#allocation3 + $0x40] sm:$0xff] %vm862_vm6, %v1884_v15 }
 0x177   : > { %v747_v60 = vpop.permute.xlu2 %746 }
 0x179   : > { %v741_v61 = vpop.permute.xlu1 %740 }
 0x17a   : > { %765 = vst.msk [vmem:[#allocation3] sm:$0xfe] %vm764_vm4, %v741_v61  ;;  %v1143_v33 = vpop.f32.mrf.mxu2 }
 0x17b   : > { %814 = vst.msk [vmem:[#allocation3] sm:$0xff] %vm813_vm5, %v1864_v59  ;;  %v691_v62 = vpop.permute.xlu0 %690 }
 0x17c   : > { %710 = vst.msk [vmem:[#allocation3 + $0x30] sm:$0xff] %vm707_vm3, %v691_v62 }
 0x17d   : > { %768 = vst.msk [vmem:[#allocation3 + $0x30] sm:$0xfe] %vm764_vm4, %v747_v60 }
 0x17e   : > { %817 = vst.msk [vmem:[#allocation3 + $0x30] sm:$0xff] %vm813_vm5, %v796_v41 }
 0x17f   : > { %v656_v63 = vpop.permute.xlu2 %655 }
 0x180   : > { %671 = vst.msk [vmem:[#allocation3 + $0x70] sm:$0xff] %vm664_vm2, %v656_v63 }
 0x181   : > { %v841_v0 = vpop.permute.xlu1 %840 }
 0x182   : > { %v1145_v37 = vpop.f32.mrf.mxu2 }
 0x183   : > { %v839_v1 = vpop.permute.xlu0 %838 }
 0x184   : > { %863 = vst.msk [vmem:[#allocation3] sm:$0xff] %vm862_vm6, %v839_v1 }
 0x185   : > { %920 = vst.msk [vmem:[#allocation3] sm:$0xfe] %vm919_vm7, %v896_v38 }
 0x186   : > { %969 = vst.msk [vmem:[#allocation3] sm:$0xff] %vm968_vm8, %v1893_v21 }
 0x187   : > { %v753_v10 = vpop.permute.xlu2 %752 }
 0x189   : > { %v743_v59 = vpop.permute.xlu1 %742 }
 0x18a   : > { %766 = vst.msk [vmem:[#allocation3 + $0x10] sm:$0xfe] %vm764_vm4, %v743_v59 }
 0x18b   : > { %815 = vst.msk [vmem:[#allocation3 + $0x10] sm:$0xff] %vm813_vm5, %v1876_v12  ;;  %v904_v2 = vpop.permute.xlu0 %903 }
 0x18c   : > { %864 = vst.msk [vmem:[#allocation3 + $0x10] sm:$0xff] %vm862_vm6, %v841_v0 }
 0x18d   : > { %921 = vst.msk [vmem:[#allocation3 + $0x10] sm:$0xfe] %vm919_vm7, %v898_v24  ;;  %v993_v6 = vld [vmem:[#allocation3] sm:$0xff] }
 0x18e   : > { %970 = vst.msk [vmem:[#allocation3 + $0x10] sm:$0xff] %vm968_vm8, %v1891_v20 }
 0x18f   : > { %924 = vst.msk [vmem:[#allocation3 + $0x40] sm:$0xfe] %vm919_vm7, %v904_v2  ;;  %v804_v16 = vpop.permute.xlu2 %803 }
 0x190   : > { %973 = vst.msk [vmem:[#allocation3 + $0x40] sm:$0xff] %vm968_vm8, %v1871_v3 }
 0x191   : > { %v906_v4 = vpop.permute.xlu1 %905 }
 0x192   : > { %925 = vst.msk [vmem:[#allocation3 + $0x50] sm:$0xfe] %vm919_vm7, %v906_v4 }
 0x193   : > { %v845_v5 = vpop.permute.xlu0 %844 }
 0x194   : > { %866 = vst.msk [vmem:[#allocation3 + $0x30] sm:$0xff] %vm862_vm6, %v845_v5 }
 0x195   : > { %923 = vst.msk [vmem:[#allocation3 + $0x30] sm:$0xfe] %vm919_vm7, %v902_v46  ;;  %v995_v7 = vld [vmem:[#allocation3 + $0x10] sm:$0xff] }
 0x196   : > { %972 = vst.msk [vmem:[#allocation3 + $0x30] sm:$0xff] %vm968_vm8, %v1922_v47  ;;  %v1009_v8 = vpack.c.bf16 %v995_v7, %v993_v6 }
 0x197   : > { %v908_v20 = vpop.permute.xlu2 %907  ;;  %v1001_v23 = vld [vmem:[#allocation3 + $0x40] sm:$0xff] }
 0x198   : > { %1113 = vmatmul.bf16.vlgmr.msrb.gmra.mxu1 %v1009_v8 }
 0x199   : > { %v745_v9 = vpop.permute.xlu1 %744 }
 0x19a   : > { %767 = vst.msk [vmem:[#allocation3 + $0x20] sm:$0xfe] %vm764_vm4, %v745_v9 }
 0x19b   : > { %816 = vst.msk [vmem:[#allocation3 + $0x20] sm:$0xff] %vm813_vm5, %v1908_v39  ;;  %v955_v3 = vpop.permute.xlu0 %954 }
 0x19c   : > { %865 = vst.msk [vmem:[#allocation3 + $0x20] sm:$0xff] %vm862_vm6, %v843_v55 }
 0x19d   : > { %922 = vst.msk [vmem:[#allocation3 + $0x20] sm:$0xfe] %vm919_vm7, %v1931_v52  ;;  %v999_v14 = vld [vmem:[#allocation3 + $0x30] sm:$0xff] }
 0x19e   : > { %971 = vst.msk [vmem:[#allocation3 + $0x20] sm:$0xff] %vm968_vm8, %v1914_v43  ;;  %v1148_v43 = vpop.f32.mrf.mxu2 }
 0x19f   : > { %974 = vst.msk [vmem:[#allocation3 + $0x50] sm:$0xff] %vm968_vm8, %v955_v3  ;;  %v959_v28 = vpop.permute.xlu2 %958 }
 0x1a1   : > { %v654_v11 = vpop.permute.xlu1 %653 }
 0x1a2   : > { %670 = vst.msk [vmem:[#allocation3 + $0x60] sm:$0xff] %vm664_vm2, %v654_v11 }
 0x1a3   : > { %v697_v12 = vpop.permute.xlu0 %696 }
 0x1a4   : > { %713 = vst.msk [vmem:[#allocation3 + $0x60] sm:$0xff] %vm707_vm3, %v697_v12 }
 0x1a5   : > { %771 = vst.msk [vmem:[#allocation3 + $0x60] sm:$0xfe] %vm764_vm4, %v753_v10  ;;  %v997_v13 = vld [vmem:[#allocation3 + $0x20] sm:$0xff] }
 0x1a6   : > { %v1011_v15 = vpack.c.bf16 %v999_v14, %v997_v13  ;;  %v1003_v22 = vld [vmem:[#allocation3 + $0x50] sm:$0xff]  ;;  %v1150_v49 = vpop.f32.mrf.mxu2 }
 0x1a7   : > { %v1013_v25 = vpack.c.bf16 %v1003_v22, %v1001_v23 }
 0x1a8   : > { %1118 = vmatmul.bf16.gmra.mxu1 %v1011_v15 }
 0x1a9   : > { %v699_v17 = vpop.permute.xlu1 %698 }
 0x1aa   : > { %714 = vst.msk [vmem:[#allocation3 + $0x70] sm:$0xff] %vm707_vm3, %v699_v17 }
 0x1ab   : > { %v755_v18 = vpop.permute.xlu0 %754 }
 0x1ac   : > { %772 = vst.msk [vmem:[#allocation3 + $0x70] sm:$0xfe] %vm764_vm4, %v755_v18 }
 0x1ad   : > { %821 = vst.msk [vmem:[#allocation3 + $0x70] sm:$0xff] %vm813_vm5, %v804_v16 }
 0x1ae   : > { %v1153_v54 = vpop.f32.mrf.mxu2 }
 0x1b1   : > { %v802_v19 = vpop.permute.xlu1 %801 }
 0x1b2   : > { %820 = vst.msk [vmem:[#allocation3 + $0x60] sm:$0xff] %vm813_vm5, %v802_v19 }
 0x1b3   : > { %v851_v21 = vpop.permute.xlu0 %850 }
 0x1b4   : > { %869 = vst.msk [vmem:[#allocation3 + $0x60] sm:$0xff] %vm862_vm6, %v851_v21 }
 0x1b5   : > { %926 = vst.msk [vmem:[#allocation3 + $0x60] sm:$0xfe] %vm919_vm7, %v908_v20 }
 0x1b6   : > { %v1155_v61 = vpop.f32.mrf.mxu2 }
 0x1b8   : > { %1123 = vmatmul.bf16.gmra.mxu1 %v1013_v25 }
 0x1b9   : > { %v853_v26 = vpop.permute.xlu1 %852 }
 0x1ba   : > { %870 = vst.msk [vmem:[#allocation3 + $0x70] sm:$0xff] %vm862_vm6, %v853_v26 }
 0x1bb   : > { %v910_v27 = vpop.permute.xlu0 %909 }
 0x1bc   : > { %927 = vst.msk [vmem:[#allocation3 + $0x70] sm:$0xfe] %vm919_vm7, %v910_v27 }
 0x1bd   : > { %976 = vst.msk [vmem:[#allocation3 + $0x70] sm:$0xff] %vm968_vm8, %v959_v28 }
 0x1be   : > { %v1158_v0 = vpop.f32.mrf.mxu2 }
 0x1c1   : > { %v957_v29 = vpop.permute.xlu1 %956 }
 0x1c2   : > { %975 = vst.msk [vmem:[#allocation3 + $0x60] sm:$0xff] %vm968_vm8, %v957_v29 }
 0x1c4   : > { %v1007_v31 = vld [vmem:[#allocation3 + $0x70] sm:$0xff] }
 0x1c6   : > { %v1160_v7 = vpop.f32.mrf.mxu2 }
 0x1c9   : > { %v1005_v30 = vld [vmem:[#allocation3 + $0x60] sm:$0xff] }
 0x1ca   : > { %v1015_v32 = vpack.c.bf16 %v1007_v31, %v1005_v30 }
 0x1cc   : > { %1128 = vmatmul.bf16.gmra.mxu1 %v1015_v32 }
 0x215   : > { %v1114_v35 = vpop.f32.mrf.mxu1 }
 0x216   : > { %v1115_v36 = vadd.f32 %v1514_v34, %v1114_v35 }
 0x218   : > { %v1144_v38 = vadd.f32 %v1143_v33, %v1115_v36 }
 0x21a   : > { %v1163_v39 = vmax.f32 %v1144_v38, 0.0 }
 0x21c   : > { %1171 = vst.msk [vmem:[%s2007_s9] sm:$0xff] %vm541_vm0, %v1163_v39 }
 0x21d   : > { %v1116_v40 = vpop.f32.mrf.mxu1 }
 0x21e   : > { %v1117_v41 = vadd.f32 %v1514_v34, %v1116_v40 }
 0x220   : > { %v1146_v42 = vadd.f32 %v1145_v37, %v1117_v41 }
 0x222   : > { %v1164_v44 = vmax.f32 %v1146_v42, 0.0 }
 0x224   : > { %1172 = vst.msk [vmem:[%s2007_s9 + $0x8] sm:$0xff] %vm541_vm0, %v1164_v44 }
 0x225   : > { %v1119_v45 = vpop.f32.mrf.mxu1 }
 0x226   : > { %v1120_v46 = vadd.f32 %v1514_v34, %v1119_v45 }
 0x228   : > { %v1149_v47 = vadd.f32 %v1148_v43, %v1120_v46 }
 0x22a   : > { %v1165_v48 = vmax.f32 %v1149_v47, 0.0 }
 0x22c   : > { %1173 = vst.msk [vmem:[%s2007_s9 + $0x10] sm:$0xff] %vm541_vm0, %v1165_v48 }
 0x22d   : > { %v1121_v50 = vpop.f32.mrf.mxu1 }
 0x22e   : > { %v1122_v51 = vadd.f32 %v1514_v34, %v1121_v50 }
 0x230   : > { %v1151_v52 = vadd.f32 %v1150_v49, %v1122_v51 }
 0x232   : > { %v1166_v53 = vmax.f32 %v1151_v52, 0.0 }
 0x234   : > { %1174 = vst.msk [vmem:[%s2007_s9 + $0x18] sm:$0xff] %vm541_vm0, %v1166_v53 }
 0x235   : > { %v1124_v55 = vpop.f32.mrf.mxu1 }
 0x236   : > { %v1125_v56 = vadd.f32 %v1514_v34, %v1124_v55 }
 0x238   : > { %v1154_v57 = vadd.f32 %v1153_v54, %v1125_v56 }
 0x23a   : > { %v1167_v24 = vmax.f32 %v1154_v57, 0.0 }
 0x23c   : > { %1175 = vst.msk [vmem:[%s2007_s9 + $0x20] sm:$0xff] %vm541_vm0, %v1167_v24 }
 0x23d   : > { %v1126_v58 = vpop.f32.mrf.mxu1 }
 0x23e   : > { %v1127_v60 = vadd.f32 %v1514_v34, %v1126_v58 }
 0x240   : > { %v1156_v62 = vadd.f32 %v1155_v61, %v1127_v60 }
 0x242   : > { %v1168_v63 = vmax.f32 %v1156_v62, 0.0 }
 0x244   : > { %1176 = vst.msk [vmem:[%s2007_s9 + $0x28] sm:$0xff] %vm541_vm0, %v1168_v63 }
 0x249   : > { %v1129_v1 = vpop.f32.mrf.mxu1 }
 0x24a   : > { %v1130_v59 = vadd.f32 %v1514_v34, %v1129_v1 }
 0x24c   : > { %v1159_v2 = vadd.f32 %v1158_v0, %v1130_v59 }
 0x24e   : > { %v1169_v4 = vmax.f32 %v1159_v2, 0.0 }
 0x250   : > { %1177 = vst.msk [vmem:[%s2007_s9 + $0x30] sm:$0xff] %vm541_vm0, %v1169_v4 }
 0x251   : > { %v1131_v5 = vpop.f32.mrf.mxu1 }
 0x252   : > { %v1132_v6 = vadd.f32 %v1514_v34, %v1131_v5 }
 0x254   : > { %v1161_v8 = vadd.f32 %v1160_v7, %v1132_v6 }
 0x256   : > { %v1170_v9 = vmax.f32 %v1161_v8, 0.0 }
 0x258   : > { %1178 = vst.msk [vmem:[%s2007_s9 + $0x38] sm:$0xff] %vm541_vm0, %v1170_v9 }
 0x259   : > { %1542 = shalt.err (!%p1539_p3)
}
 0x25a   : > { %s1587_s7 = smov 128   ;;  %s1588_s8 = smov 8  }
 0x25b   : > { %1464 = dma.vmem_to_hbm [thread:$0]  (%p1657_p5), %s1193_s14, 1024, %s1195_s15, %s1180_s22, %s1587_s7, %s1587_s7, %s1588_s8  }
 0x25c PF: > { %p1470_p4 = scmp.ge.s32.totalorder %s1577_s21, 2  ;;  %s1209_s9 = sand.u32 1, %s1565_s18  }
 0x25d   : > { %s1210_s10 = scalar_lea.sflag [#allocation5], %s1209_s9 }
 0x25e   : > { %p1467_p7 = pnand %p1470_p4, %p1661_p6 }
 0x260   : > { %p1468_p8 = pneg %p1467_p7 }
 0x262   : > { %1560 = dma.done.wait (%p1468_p8), %s1210_s10, 1024  }
 0x263   : > { %1562 = vsyncadd (%p1468_p8), %s1210_s10, 4294966272  ;;  %p15_p9 = scmp.ge.s32.totalorder %s1644_s24, 4   ;;  %s2067_s18 = smov %s1569_s19 }
 0x264   : > { %s2068_s19 = smov %s1573_s20  ;;  %s2069_s20 = smov %s1655_s27 }
 0x265   : > { %s2070_s21 = smov %s1644_s24  ;;  %17 = sbr.rel (!%p15_p9) target bundleno = 3 (0x3), region = 79 }
 0x26a   :  { %1216 = vsyncpa [#allocation5], 1 }
 0x26b   :  { %1218 = vsyncpa [#allocation5 + $0x1], 1 }

</bundles_post_ra>
